<compile_context>
chip_gen: v6e
topology: v6e:2x2x1
jax: 0.10.0
libtpu: 0.0.40
codegen_flags: <defaults>
</compile_context>

<pallas_src>
import functools
from typing import NamedTuple

import jax
import jax.numpy as jnp
from jax.experimental import pallas as pl
from jax.experimental.pallas import tpu as pltpu


# --------------------------------------------------------------------------- #
# helpers
# --------------------------------------------------------------------------- #
def _round_up(x: int, m: int) -> int:
    return (x + m - 1) // m * m


@functools.lru_cache(maxsize=1)
def _vmem_limit_bytes() -> int:
    """Generation-aware VMEM cap with headroom for Mosaic internal scratch."""
    try:
        cap = int(pltpu.get_tpu_info().vmem_capacity_bytes)
    except Exception:
        cap = 64 * 1024 * 1024          # conservative (v7x-safe) fallback
    return min(cap - 16 * 1024 * 1024, 112 * 1024 * 1024)


def _choose_gene_tiling(n_out: int, gene_tile: int):
    """Pick (n_padded, tile): tile is a multiple of 128 and divides n_padded,
    with n_padded as close to round_up(n_out, 128) as practical."""
    gene_tile = max(128, _round_up(gene_tile, 128))
    n128 = _round_up(n_out, 128)
    if n128 <= gene_tile:
        return n128, n128               # single tile, minimal padding
    for cand in range(gene_tile, max(127, gene_tile // 2 - 1), -128):
        if n128 % cand == 0:
            return n128, cand           # exact divisor -> minimal padding
    return _round_up(n_out, gene_tile), gene_tile


def _choose_batch_tiling(b: int, max_bt: int):
    b_pad = _round_up(max(b, 1), 8)
    max_bt = max(8, (max_bt // 8) * 8)
    if b_pad <= max_bt:
        return b_pad, b_pad
    for cand in range(max_bt, 7, -8):
        if b_pad % cand == 0:
            return b_pad, cand
    return b_pad, 8


class DecoderGeometry(NamedTuple):
    n_output: int
    n_padded: int
    gene_tile: int


def prepare_decoder_params(params, *, gene_tile: int = 2048):
    """One-time (per-checkpoint) prep: pad the gene axis and cast head weights
    to bf16.  Do this at parameter-load time, NOT per forward call."""
    n_out = params["ws"].shape[1]
    n_pad, tile = _choose_gene_tiling(n_out, gene_tile)
    padc = n_pad - n_out

    def pad_w(w):
        return jnp.pad(w.astype(jnp.bfloat16), ((0, 0), (0, padc)))

    def pad_b(bias, fill=0.0):
        return jnp.pad(bias, ((0, 0), (0, padc)), constant_values=fill)

    packed = dict(
        w1=params["w1"], b1=params["b1"],
        gamma=params["gamma"], beta=params["beta"],
        ws=pad_w(params["ws"]), bs=pad_b(params["bs"], -1e30),  # padded genes -> exp()==0
        wr=pad_w(params["wr"]), br=pad_b(params["br"]),
        wd=pad_w(params["wd"]), bd=pad_b(params["bd"]),
        wa=pad_w(params["wa"]), ba=pad_b(params["ba"]),
    )
    return packed, DecoderGeometry(n_out, n_pad, tile)


# --------------------------------------------------------------------------- #
# Kernel A: px = ReLU(BN(Linear(z))) + online softmax stats over gene tiles
# --------------------------------------------------------------------------- #
def _stats_kernel(n_valid, z_ref, lib_ref, w1_ref, b1_ref, g_ref, be_ref,
                  ws_ref, bs_ref,
                  px_ref, m_ref, invl_ref, rs_ref,
                  l_sc):
    j = pl.program_id(0)

    @pl.when(j == 0)
    def _init():
        h = (jnp.dot(z_ref[...], w1_ref[...],
                     preferred_element_type=jnp.float32) + b1_ref[...])
        # training-mode BatchNorm over the *valid* rows only (biased var, eps=1e-3)
        row = jax.lax.broadcasted_iota(jnp.int32, h.shape, 0)
        mask = (row < n_valid).astype(jnp.float32)
        inv_n = jnp.float32(1.0 / n_valid)
        mean = jnp.sum(h * mask, axis=0, keepdims=True) * inv_n
        cen = (h - mean) * mask
        var = jnp.sum(cen * cen, axis=0, keepdims=True) * inv_n
        hbn = (h - mean) * jax.lax.rsqrt(var + 1e-3) * g_ref[...] + be_ref[...]
        # px carried / emitted directly as bf16 in the (resident) output block.
        px_ref[...] = jnp.maximum(hbn, 0.0).astype(px_ref.dtype)
        m_ref[...] = jnp.full(m_ref.shape, -jnp.inf, dtype=jnp.float32)
        l_sc[...] = jnp.zeros(l_sc.shape, dtype=jnp.float32)

    # online softmax statistics for this gene tile (bf16 x bf16 -> f32 MXU)
    logits = (jnp.dot(px_ref[...], ws_ref[...],
                      preferred_element_type=jnp.float32) + bs_ref[...])
    m_prev = m_ref[...]
    m_new = jnp.maximum(m_prev, jnp.max(logits, axis=-1, keepdims=True))
    l_sc[...] = (l_sc[...] * jnp.exp(m_prev - m_new)
                 + jnp.sum(jnp.exp(logits - m_new), axis=-1, keepdims=True))
    m_ref[...] = m_new

    @pl.when(j == pl.num_programs(0) - 1)
    def _finalize():
        inv_l = pl.reciprocal(l_sc[...], approx=True)       # EUP slot, ~free
        explib = jnp.exp(jnp.minimum(lib_ref[...], 12.0))   # computed once
        invl_ref[...] = inv_l
        rs_ref[...] = explib * inv_l


# --------------------------------------------------------------------------- #
# Kernel B: per (gene-tile, batch-tile) sequential head matmuls
# --------------------------------------------------------------------------- #
def _make_heads_kernel(with_r):
    def kernel(px_ref, m_ref, invl_ref, rs_ref,
               ws_ref, bs_ref, wd_ref, bd_ref, wa_ref, ba_ref, *rest):
        if with_r:
            (wr_ref, br_ref,
             scale_ref, rate_ref, drop_ref, alpha_ref, r_ref) = rest
        else:
            (scale_ref, rate_ref, drop_ref, alpha_ref) = rest

        px = px_ref[...]                                     # bf16 (bt, H)

        def head(w_ref, b_ref):
            return (jnp.dot(px, w_ref[...],
                            preferred_element_type=jnp.float32) + b_ref[...])

        # Sequential width-T matmuls; each head's f32 intermediate is written to
        # its output immediately (peak live intermediate 1x, not 4x).
        e = jnp.exp(head(ws_ref, bs_ref) - m_ref[...])       # m = row max (pass A)
        scale_ref[...] = e * invl_ref[...]                   # softmax(logits)
        rate_ref[...] = jnp.minimum(e * rs_ref[...], 12.0)   # rs = exp(clamp(lib)) / l
        drop_ref[...] = head(wd_ref, bd_ref)
        alpha_ref[...] = jnp.maximum(head(wa_ref, ba_ref), 0.0) + 1.0
        if with_r:
            r_ref[...] = jnp.maximum(head(wr_ref, br_ref), 0.0)
    return kernel


# --------------------------------------------------------------------------- #
# forward
# --------------------------------------------------------------------------- #
def decoder_scvi_forward(dispersion, z, library, packed, geom, *,
                         batch_tile=256, crop_outputs=True):
    """Mirrors DecoderSCVI.forward; returns (px_scale, px_r, px_rate, px_dropout, px_alpha).

    `packed, geom = prepare_decoder_params(params)` must be done once at load time.
    """
    b, n_in = z.shape
    h_dim = packed["w1"].shape[1]
    n_out, n_pad, t = geom
    nt = n_pad // t
    b_pad, bt = _choose_batch_tiling(b, batch_tile)
    nb = b_pad // bt
    vmem_limit = _vmem_limit_bytes()

    z_p = jnp.pad(z, ((0, b_pad - b), (0, 0))) if b_pad != b else z
    lib_p = jnp.pad(library, ((0, b_pad - b), (0, 0))) if b_pad != b else library

    # ---- pass A: px, softmax stats, exp(clamp(library)) ----------------------
    px, m_row, inv_l, rate_scale = pl.pallas_call(
        functools.partial(_stats_kernel, b),
        out_shape=(
            jax.ShapeDtypeStruct((b_pad, h_dim), jnp.bfloat16),   # px (bf16)
            jax.ShapeDtypeStruct((b_pad, 1), jnp.float32),        # row max
            jax.ShapeDtypeStruct((b_pad, 1), jnp.float32),        # 1 / exp-sum
            jax.ShapeDtypeStruct((b_pad, 1), jnp.float32),        # exp(lib) / exp-sum
        ),
        grid_spec=pltpu.PrefetchScalarGridSpec(
            num_scalar_prefetch=0,
            grid=(nt,),
            in_specs=[
                pl.BlockSpec((b_pad, n_in), lambda j: (0, 0)),
                pl.BlockSpec((b_pad, 1), lambda j: (0, 0)),
                pl.BlockSpec((n_in, h_dim), lambda j: (0, 0)),
                pl.BlockSpec((1, h_dim), lambda j: (0, 0)),
                pl.BlockSpec((1, h_dim), lambda j: (0, 0)),
                pl.BlockSpec((1, h_dim), lambda j: (0, 0)),
                pl.BlockSpec((h_dim, t), lambda j: (0, j)),   # ws streamed by tile
                pl.BlockSpec((1, t), lambda j: (0, j)),
            ],
            out_specs=[
                pl.BlockSpec((b_pad, h_dim), lambda j: (0, 0)),
                pl.BlockSpec((b_pad, 1), lambda j: (0, 0)),
                pl.BlockSpec((b_pad, 1), lambda j: (0, 0)),
                pl.BlockSpec((b_pad, 1), lambda j: (0, 0)),
            ],
            scratch_shapes=[pltpu.VMEM((b_pad, 1), jnp.float32)],  # running exp-sum
        ),
        compiler_params=pltpu.CompilerParams(
            dimension_semantics=("arbitrary",),                 # carried softmax stats
            vmem_limit_bytes=vmem_limit,
        ),
    )(z_p, lib_p, packed["w1"], packed["b1"], packed["gamma"], packed["beta"],
      packed["ws"], packed["bs"])

    # ---- pass B: head matmuls, tiled over (gene, batch) ----------------------
    with_r = (dispersion == "gene-cell")
    head_names = [("ws", "bs"), ("wd", "bd"), ("wa", "ba")]
    if with_r:
        head_names.append(("wr", "br"))          # skip the r head entirely otherwise

    act_spec_px = pl.BlockSpec((bt, h_dim), lambda j, i: (i, 0))
    act_spec_1 = pl.BlockSpec((bt, 1), lambda j, i: (i, 0))
    w_spec = pl.BlockSpec((h_dim, t), lambda j, i: (0, j))
    bias_spec = pl.BlockSpec((1, t), lambda j, i: (0, j))

    in_specs = ([act_spec_px, act_spec_1, act_spec_1, act_spec_1]
                + [s for _ in head_names for s in (w_spec, bias_spec)])
    weight_args = [packed[name] for pair in head_names for name in pair]

    n_outs = 5 if with_r else 4
    out_spec = pl.BlockSpec((bt, t), lambda j, i: (i, j))
    out_shape = tuple(jax.ShapeDtypeStruct((b_pad, n_pad), jnp.float32)
                      for _ in range(n_outs))

    outs = pl.pallas_call(
        _make_heads_kernel(with_r),
        out_shape=out_shape,
        grid_spec=pltpu.PrefetchScalarGridSpec(
            num_scalar_prefetch=0,
            grid=(nt, nb),        # gene outer (weights stream from HBM once), batch inner
            in_specs=in_specs,
            out_specs=[out_spec] * n_outs,
        ),
        compiler_params=pltpu.CompilerParams(
            dimension_semantics=("parallel", "parallel"),        # megacore sharding
            vmem_limit_bytes=vmem_limit,
        ),
    )(px, m_row, inv_l, rate_scale, *weight_args)

    if with_r:
        px_scale, px_rate, px_dropout, px_alpha, px_r = outs
    else:
        px_scale, px_rate, px_dropout, px_alpha = outs
        px_r = None

    # Crop is skipped entirely when padding is a no-op; production callers should
    # pass crop_outputs=False and mask padded genes/rows in the loss instead.
    if crop_outputs and (b_pad != b or n_pad != n_out):
        def crop(a):
            return a[:b, :n_out]
        px_scale, px_rate, px_dropout, px_alpha = (
            crop(px_scale), crop(px_rate), crop(px_dropout), crop(px_alpha))
        if px_r is not None:
            px_r = crop(px_r)

    return px_scale, px_r, px_rate, px_dropout, px_alpha


# --------------------------------------------------------------------------- #
# parameter init (PyTorch-Linear-like) and pure-JAX reference
# --------------------------------------------------------------------------- #
def init_params(key, n_input, n_hidden, n_output):
    ks = jax.random.split(key, 10)

    def lin(kw, kb, fan_in, fan_out):
        bound = 1.0 / jnp.sqrt(jnp.float32(fan_in))
        w = jax.random.uniform(kw, (fan_in, fan_out), jnp.float32, -bound, bound)
        b = jax.random.uniform(kb, (1, fan_out), jnp.float32, -bound, bound)
        return w, b

    w1, b1 = lin(ks[0], ks[1], n_input, n_hidden)
    ws, bs = lin(ks[2], ks[3], n_hidden, n_output)
    wr, br = lin(ks[4], ks[5], n_hidden, n_output)
    wd, bd = lin(ks[6], ks[7], n_hidden, n_output)
    wa, ba = lin(ks[8], ks[9], n_hidden, n_output)
    return dict(
        w1=w1, b1=b1,
        gamma=jnp.ones((1, n_hidden), jnp.float32),
        beta=jnp.zeros((1, n_hidden), jnp.float32),
        ws=ws, bs=bs, wr=wr, br=br, wd=wd, bd=bd, wa=wa, ba=ba,
    )


def decoder_scvi_reference(dispersion, z, library, params):
    """Pure-JAX reference with the same bf16 head-input / head-weight path."""
    h = z @ params["w1"] + params["b1"]
    mean = jnp.mean(h, axis=0, keepdims=True)
    var = jnp.mean((h - mean) ** 2, axis=0, keepdims=True)
    px = jnp.maximum(
        (h - mean) * jax.lax.rsqrt(var + 1e-3) * params["gamma"] + params["beta"], 0.0)
    pxb = px.astype(jnp.bfloat16)

    def head(w, bias):
        return jnp.dot(pxb, w.astype(jnp.bfloat16),
                       preferred_element_type=jnp.float32) + bias

    px_scale = jax.nn.softmax(head(params["ws"], params["bs"]), axis=-1)
    px_dropout = head(params["wd"], params["bd"])
    px_alpha = jnp.maximum(head(params["wa"], params["ba"]), 0.0) + 1.0
    lib = jnp.minimum(library, 12.0)
    px_rate = jnp.minimum(jnp.exp(lib) * px_scale, 12.0)
    px_r = (jnp.maximum(head(params["wr"], params["br"]), 0.0)
            if dispersion == "gene-cell" else None)
    return px_scale, px_r, px_rate, px_dropout, px_alpha


# --------------------------------------------------------------------------- #
# demo
# --------------------------------------------------------------------------- #
if __name__ == "__main__":
    # small demo shapes; exercises batch padding (6 -> 8 rows) and gene padding
    # (300 -> 384 cols, single gene tile).
    B, n_input, n_hidden, n_output = 6, 16, 128, 300

    key = jax.random.PRNGKey(0)
    k_z, k_lib, k_p = jax.random.split(key, 3)

    z = jax.random.normal(k_z, (B, n_input), jnp.float32)
    library = jax.random.normal(k_lib, (B, 1), jnp.float32) * 2.0 + 6.0
    params = init_params(k_p, n_input, n_hidden, n_output)

    # one-time weight prep (per-checkpoint, not per-call)
    packed, geom = prepare_decoder_params(params, gene_tile=2048)

    outs = decoder_scvi_forward("gene-cell", z, library, packed, geom)
    jax.block_until_ready(outs)
    px_scale, px_r, px_rate, px_dropout, px_alpha = outs

    # invariants of the module
    for o in (px_scale, px_r, px_rate, px_dropout, px_alpha):
        assert o.shape == (B, n_output)
        assert bool(jnp.all(jnp.isfinite(o)))
    assert bool(jnp.allclose(jnp.sum(px_scale, axis=-1), 1.0, atol=5e-3))
    assert bool(jnp.all(px_scale >= 0.0))
    assert bool(jnp.all(px_r >= 0.0))
    assert bool(jnp.all(px_alpha >= 1.0))
    assert bool(jnp.all(px_rate <= 12.0 + 1e-5))

    # numerical check against the pure-JAX reference
    ref = decoder_scvi_reference("gene-cell", z, library, params)
    names = ("px_scale", "px_r", "px_rate", "px_dropout", "px_alpha")
    for name, got, want in zip(names, outs, ref):
        assert bool(jnp.allclose(got, want, rtol=1e-2, atol=1e-2)), name

    # also exercise the "gene" dispersion path (3-head kernel, px_r skipped)
    outs_g = decoder_scvi_forward("gene", z, library, packed, geom)
    jax.block_until_ready(outs_g)
    assert outs_g[1] is None
    assert bool(jnp.allclose(outs_g[0], px_scale, rtol=1e-3, atol=1e-3))

    print("KERNEL_OK")
</pallas_src>

<mosaic_0001>
module attributes {stable_mosaic.version = 11 : i64} {
  func.func @_stats_kernel(%arg0: i32, %arg1: memref<8x16xf32, #tpu.memory_space<vmem>>, %arg2: memref<8x1xf32, #tpu.memory_space<vmem>>, %arg3: memref<16x128xf32, #tpu.memory_space<vmem>>, %arg4: memref<1x128xf32, #tpu.memory_space<vmem>>, %arg5: memref<1x128xf32, #tpu.memory_space<vmem>>, %arg6: memref<1x128xf32, #tpu.memory_space<vmem>>, %arg7: memref<128x384xbf16, #tpu.memory_space<vmem>>, %arg8: memref<1x384xf32, #tpu.memory_space<vmem>>, %arg9: memref<8x128xbf16, #tpu.memory_space<vmem>>, %arg10: memref<8x1xf32, #tpu.memory_space<vmem>>, %arg11: memref<8x1xf32, #tpu.memory_space<vmem>>, %arg12: memref<8x1xf32, #tpu.memory_space<vmem>>, %arg13: memref<8x1xf32, #tpu.memory_space<vmem>>) attributes {dimension_semantics = [#tpu.dimension_semantics<arbitrary>], iteration_bounds = array<i64: 1>, scalar_prefetch = 0 : i64, scratch_operands = 1 : i64, tpu.core_type = #tpu.core_type<tc>, window_params = [{pipeline_mode = #tpu.pipeline_mode<synchronous>, transform_indices = @transform_0, window_bounds = array<i64: 8, 16>}, {pipeline_mode = #tpu.pipeline_mode<synchronous>, transform_indices = @transform_1, window_bounds = array<i64: 8, 1>}, {pipeline_mode = #tpu.pipeline_mode<synchronous>, transform_indices = @transform_2, window_bounds = array<i64: 16, 128>}, {pipeline_mode = #tpu.pipeline_mode<synchronous>, transform_indices = @transform_3, window_bounds = array<i64: 1, 128>}, {pipeline_mode = #tpu.pipeline_mode<synchronous>, transform_indices = @transform_4, window_bounds = array<i64: 1, 128>}, {pipeline_mode = #tpu.pipeline_mode<synchronous>, transform_indices = @transform_5, window_bounds = array<i64: 1, 128>}, {transform_indices = @transform_6, window_bounds = array<i64: 128, 384>}, {transform_indices = @transform_7, window_bounds = array<i64: 1, 384>}, {pipeline_mode = #tpu.pipeline_mode<synchronous>, transform_indices = @transform_8, window_bounds = array<i64: 8, 128>}, {pipeline_mode = #tpu.pipeline_mode<synchronous>, transform_indices = @transform_9, window_bounds = array<i64: 8, 1>}, {pipeline_mode = #tpu.pipeline_mode<synchronous>, transform_indices = @transform_10, window_bounds = array<i64: 8, 1>}, {pipeline_mode = #tpu.pipeline_mode<synchronous>, transform_indices = @transform_11, window_bounds = array<i64: 8, 1>}]} {
    %c0_i32 = arith.constant 0 : i32
    %0 = arith.cmpi eq, %arg0, %c0_i32 : i32
    %1 = arith.extui %0 : i1 to i32
    %c0_i32_0 = arith.constant 0 : i32
    %2 = arith.cmpi ne, %1, %c0_i32_0 : i32
    scf.if %2 {
      %c0_18 = arith.constant 0 : index
      %c0_19 = arith.constant 0 : index
      %28 = vector.load %arg1[%c0_18, %c0_19] : memref<8x16xf32, #tpu.memory_space<vmem>>, vector<8x16xf32>
      %c0_20 = arith.constant 0 : index
      %c0_21 = arith.constant 0 : index
      %29 = vector.load %arg3[%c0_20, %c0_21] : memref<16x128xf32, #tpu.memory_space<vmem>>, vector<16x128xf32>
      %cst_22 = arith.constant dense<0.000000e+00> : vector<8x128xf32>
      %30 = tpu.matmul %28, %29, %cst_22 {dimension_numbers = #tpu.dot_dimension_numbers<[1], [0], [0], [1], [0, 0, 1, 1], [], []>} : vector<8x16xf32>, vector<16x128xf32>, vector<8x128xf32> -> vector<8x128xf32>
      %c0_23 = arith.constant 0 : index
      %c0_24 = arith.constant 0 : index
      %31 = vector.load %arg4[%c0_23, %c0_24] : memref<1x128xf32, #tpu.memory_space<vmem>>, vector<1x128xf32>
      %32 = vector.broadcast %31 : vector<1x128xf32> to vector<8x128xf32>
      %33 = arith.addf %30, %32 : vector<8x128xf32>
      %34 = tpu.iota {dimensions = array<i32: 0>} : vector<8x128xi32>
      %c6_i32 = arith.constant 6 : i32
      %35 = vector.broadcast %c6_i32 : i32 to vector<8x128xi32>
      %36 = arith.cmpi slt, %34, %35 : vector<8x128xi32>
      %37 = arith.extui %36 : vector<8x128xi1> to vector<8x128xi32>
      %38 = arith.sitofp %37 : vector<8x128xi32> to vector<8x128xf32>
      %39 = arith.mulf %33, %38 : vector<8x128xf32>
      %cst_25 = arith.constant dense<0.000000e+00> : vector<128xf32>
      %40 = vector.multi_reduction <add>, %39, %cst_25 [0] : vector<8x128xf32> to vector<128xf32>
      %41 = vector.shape_cast %40 : vector<128xf32> to vector<1x128xf32>
      %cst_26 = arith.constant 0.166666672 : f32
      %42 = vector.broadcast %cst_26 : f32 to vector<1x128xf32>
      %43 = arith.mulf %41, %42 : vector<1x128xf32>
      %44 = vector.broadcast %43 : vector<1x128xf32> to vector<8x128xf32>
      %45 = arith.subf %33, %44 : vector<8x128xf32>
      %46 = arith.mulf %45, %38 : vector<8x128xf32>
      %47 = arith.mulf %46, %46 : vector<8x128xf32>
      %cst_27 = arith.constant dense<0.000000e+00> : vector<128xf32>
      %48 = vector.multi_reduction <add>, %47, %cst_27 [0] : vector<8x128xf32> to vector<128xf32>
      %49 = vector.shape_cast %48 : vector<128xf32> to vector<1x128xf32>
      %cst_28 = arith.constant 0.166666672 : f32
      %50 = vector.broadcast %cst_28 : f32 to vector<1x128xf32>
      %51 = arith.mulf %49, %50 : vector<1x128xf32>
      %52 = vector.broadcast %43 : vector<1x128xf32> to vector<8x128xf32>
      %53 = arith.subf %33, %52 : vector<8x128xf32>
      %cst_29 = arith.constant 1.000000e-03 : f32
      %54 = vector.broadcast %cst_29 : f32 to vector<1x128xf32>
      %55 = arith.addf %51, %54 : vector<1x128xf32>
      %56 = math.rsqrt %55 : vector<1x128xf32>
      %57 = vector.broadcast %56 : vector<1x128xf32> to vector<8x128xf32>
      %58 = arith.mulf %53, %57 : vector<8x128xf32>
      %c0_30 = arith.constant 0 : index
      %c0_31 = arith.constant 0 : index
      %59 = vector.load %arg5[%c0_30, %c0_31] : memref<1x128xf32, #tpu.memory_space<vmem>>, vector<1x128xf32>
      %60 = vector.broadcast %59 : vector<1x128xf32> to vector<8x128xf32>
      %61 = arith.mulf %58, %60 : vector<8x128xf32>
      %c0_32 = arith.constant 0 : index
      %c0_33 = arith.constant 0 : index
      %62 = vector.load %arg6[%c0_32, %c0_33] : memref<1x128xf32, #tpu.memory_space<vmem>>, vector<1x128xf32>
      %63 = vector.broadcast %62 : vector<1x128xf32> to vector<8x128xf32>
      %64 = arith.addf %61, %63 : vector<8x128xf32>
      %cst_34 = arith.constant 0.000000e+00 : f32
      %65 = vector.broadcast %cst_34 : f32 to vector<8x128xf32>
      %66 = arith.maximumf %64, %65 : vector<8x128xf32>
      %67 = arith.truncf %66 : vector<8x128xf32> to vector<8x128xbf16>
      %c0_35 = arith.constant 0 : index
      %c0_36 = arith.constant 0 : index
      %68 = vector.load %arg9[%c0_35, %c0_36] : memref<8x128xbf16, #tpu.memory_space<vmem>>, vector<8x128xbf16>
      tpu.vector_store %arg9[%c0_35, %c0_36], %67 {strides = array<i32>} : memref<8x128xbf16, #tpu.memory_space<vmem>>, vector<8x128xbf16>,
      %cst_37 = arith.constant 0xFF800000 : f32
      %69 = vector.broadcast %cst_37 : f32 to vector<8x1xf32>
      %c0_38 = arith.constant 0 : index
      %c0_39 = arith.constant 0 : index
      %70 = vector.load %arg10[%c0_38, %c0_39] : memref<8x1xf32, #tpu.memory_space<vmem>>, vector<8x1xf32>
      tpu.vector_store %arg10[%c0_38, %c0_39], %69 {strides = array<i32>} : memref<8x1xf32, #tpu.memory_space<vmem>>, vector<8x1xf32>,
      %cst_40 = arith.constant 0.000000e+00 : f32
      %71 = vector.broadcast %cst_40 : f32 to vector<8x1xf32>
      %c0_41 = arith.constant 0 : index
      %c0_42 = arith.constant 0 : index
      %72 = vector.load %arg13[%c0_41, %c0_42] : memref<8x1xf32, #tpu.memory_space<vmem>>, vector<8x1xf32>
      tpu.vector_store %arg13[%c0_41, %c0_42], %71 {strides = array<i32>} : memref<8x1xf32, #tpu.memory_space<vmem>>, vector<8x1xf32>,
    } else {
    }
    %c0 = arith.constant 0 : index
    %c0_1 = arith.constant 0 : index
    %3 = vector.load %arg9[%c0, %c0_1] : memref<8x128xbf16, #tpu.memory_space<vmem>>, vector<8x128xbf16>
    %c0_2 = arith.constant 0 : index
    %c0_3 = arith.constant 0 : index
    %4 = vector.load %arg7[%c0_2, %c0_3] : memref<128x384xbf16, #tpu.memory_space<vmem>>, vector<128x384xbf16>
    %cst = arith.constant dense<0.000000e+00> : vector<8x384xf32>
    %5 = tpu.matmul %3, %4, %cst {dimension_numbers = #tpu.dot_dimension_numbers<[1], [0], [0], [1], [0, 0, 1, 1], [], []>} : vector<8x128xbf16>, vector<128x384xbf16>, vector<8x384xf32> -> vector<8x384xf32>
    %c0_4 = arith.constant 0 : index
    %c0_5 = arith.constant 0 : index
    %6 = vector.load %arg8[%c0_4, %c0_5] : memref<1x384xf32, #tpu.memory_space<vmem>>, vector<1x384xf32>
    %7 = vector.broadcast %6 : vector<1x384xf32> to vector<8x384xf32>
    %8 = arith.addf %5, %7 : vector<8x384xf32>
    %c0_6 = arith.constant 0 : index
    %c0_7 = arith.constant 0 : index
    %9 = vector.load %arg10[%c0_6, %c0_7] : memref<8x1xf32, #tpu.memory_space<vmem>>, vector<8x1xf32>
    %cst_8 = arith.constant dense<0xFF800000> : vector<8xf32>
    %10 = vector.multi_reduction <maximumf>, %8, %cst_8 [1] : vector<8x384xf32> to vector<8xf32>
    %11 = vector.shape_cast %10 : vector<8xf32> to vector<8x1xf32>
    %12 = arith.maximumf %9, %11 : vector<8x1xf32>
    %c0_9 = arith.constant 0 : index
    %c0_10 = arith.constant 0 : index
    %13 = vector.load %arg13[%c0_9, %c0_10] : memref<8x1xf32, #tpu.memory_space<vmem>>, vector<8x1xf32>
    %14 = arith.subf %9, %12 : vector<8x1xf32>
    %15 = math.exp %14 : vector<8x1xf32>
    %16 = arith.mulf %13, %15 : vector<8x1xf32>
    %17 = vector.broadcast %12 : vector<8x1xf32> to vector<8x384xf32>
    %18 = arith.subf %8, %17 : vector<8x384xf32>
    %19 = math.exp %18 : vector<8x384xf32>
    %cst_11 = arith.constant dense<0.000000e+00> : vector<8xf32>
    %20 = vector.multi_reduction <add>, %19, %cst_11 [1] : vector<8x384xf32> to vector<8xf32>
    %21 = vector.shape_cast %20 : vector<8xf32> to vector<8x1xf32>
    %22 = arith.addf %16, %21 : vector<8x1xf32>
    %c0_12 = arith.constant 0 : index
    %c0_13 = arith.constant 0 : index
    %23 = vector.load %arg13[%c0_12, %c0_13] : memref<8x1xf32, #tpu.memory_space<vmem>>, vector<8x1xf32>
    tpu.vector_store %arg13[%c0_12, %c0_13], %22 {strides = array<i32>} : memref<8x1xf32, #tpu.memory_space<vmem>>, vector<8x1xf32>,
    %c0_14 = arith.constant 0 : index
    %c0_15 = arith.constant 0 : index
    %24 = vector.load %arg10[%c0_14, %c0_15] : memref<8x1xf32, #tpu.memory_space<vmem>>, vector<8x1xf32>
    tpu.vector_store %arg10[%c0_14, %c0_15], %12 {strides = array<i32>} : memref<8x1xf32, #tpu.memory_space<vmem>>, vector<8x1xf32>,
    %c0_i32_16 = arith.constant 0 : i32
    %25 = arith.cmpi eq, %arg0, %c0_i32_16 : i32
    %26 = arith.extui %25 : i1 to i32
    %c0_i32_17 = arith.constant 0 : i32
    %27 = arith.cmpi ne, %26, %c0_i32_17 : i32
    scf.if %27 {
      %c0_18 = arith.constant 0 : index
      %c0_19 = arith.constant 0 : index
      %28 = vector.load %arg13[%c0_18, %c0_19] : memref<8x1xf32, #tpu.memory_space<vmem>>, vector<8x1xf32>
      %29 = tpu.reciprocal %28 {approx = true} : vector<8x1xf32> -> vector<8x1xf32>
      %c0_20 = arith.constant 0 : index
      %c0_21 = arith.constant 0 : index
      %30 = vector.load %arg2[%c0_20, %c0_21] : memref<8x1xf32, #tpu.memory_space<vmem>>, vector<8x1xf32>
      %cst_22 = arith.constant 1.200000e+01 : f32
      %31 = vector.broadcast %cst_22 : f32 to vector<8x1xf32>
      %32 = arith.minimumf %30, %31 : vector<8x1xf32>
      %33 = math.exp %32 : vector<8x1xf32>
      %c0_23 = arith.constant 0 : index
      %c0_24 = arith.constant 0 : index
      %34 = vector.load %arg11[%c0_23, %c0_24] : memref<8x1xf32, #tpu.memory_space<vmem>>, vector<8x1xf32>
      tpu.vector_store %arg11[%c0_23, %c0_24], %29 {strides = array<i32>} : memref<8x1xf32, #tpu.memory_space<vmem>>, vector<8x1xf32>,
      %35 = arith.mulf %33, %29 : vector<8x1xf32>
      %c0_25 = arith.constant 0 : index
      %c0_26 = arith.constant 0 : index
      %36 = vector.load %arg12[%c0_25, %c0_26] : memref<8x1xf32, #tpu.memory_space<vmem>>, vector<8x1xf32>
      tpu.vector_store %arg12[%c0_25, %c0_26], %35 {strides = array<i32>} : memref<8x1xf32, #tpu.memory_space<vmem>>, vector<8x1xf32>,
    } else {
    }
    return
  }
  func.func @transform_0(%arg0: i32) -> (i32, i32) {
    %c0_i32 = arith.constant 0 : i32
    %c0_i32_0 = arith.constant 0 : i32
    %c0_i32_1 = arith.constant 0 : i32
    return %c0_i32, %c0_i32_0 : i32, i32
  }
  func.func @transform_1(%arg0: i32) -> (i32, i32) {
    %c0_i32 = arith.constant 0 : i32
    %c0_i32_0 = arith.constant 0 : i32
    %c0_i32_1 = arith.constant 0 : i32
    return %c0_i32, %c0_i32_0 : i32, i32
  }
  func.func @transform_2(%arg0: i32) -> (i32, i32) {
    %c0_i32 = arith.constant 0 : i32
    %c0_i32_0 = arith.constant 0 : i32
    %c0_i32_1 = arith.constant 0 : i32
    return %c0_i32, %c0_i32_0 : i32, i32
  }
  func.func @transform_3(%arg0: i32) -> (i32, i32) {
    %c0_i32 = arith.constant 0 : i32
    %c0_i32_0 = arith.constant 0 : i32
    %c0_i32_1 = arith.constant 0 : i32
    return %c0_i32, %c0_i32_0 : i32, i32
  }
  func.func @transform_4(%arg0: i32) -> (i32, i32) {
    %c0_i32 = arith.constant 0 : i32
    %c0_i32_0 = arith.constant 0 : i32
    %c0_i32_1 = arith.constant 0 : i32
    return %c0_i32, %c0_i32_0 : i32, i32
  }
  func.func @transform_5(%arg0: i32) -> (i32, i32) {
    %c0_i32 = arith.constant 0 : i32
    %c0_i32_0 = arith.constant 0 : i32
    %c0_i32_1 = arith.constant 0 : i32
    return %c0_i32, %c0_i32_0 : i32, i32
  }
  func.func @transform_6(%arg0: i32) -> (i32, i32) {
    %c0_i32 = arith.constant 0 : i32
    %c0_i32_0 = arith.constant 0 : i32
    return %c0_i32, %arg0 : i32, i32
  }
  func.func @transform_7(%arg0: i32) -> (i32, i32) {
    %c0_i32 = arith.constant 0 : i32
    %c0_i32_0 = arith.constant 0 : i32
    return %c0_i32, %arg0 : i32, i32
  }
  func.func @transform_8(%arg0: i32) -> (i32, i32) {
    %c0_i32 = arith.constant 0 : i32
    %c0_i32_0 = arith.constant 0 : i32
    %c0_i32_1 = arith.constant 0 : i32
    return %c0_i32, %c0_i32_0 : i32, i32
  }
  func.func @transform_9(%arg0: i32) -> (i32, i32) {
    %c0_i32 = arith.constant 0 : i32
    %c0_i32_0 = arith.constant 0 : i32
    %c0_i32_1 = arith.constant 0 : i32
    return %c0_i32, %c0_i32_0 : i32, i32
  }
  func.func @transform_10(%arg0: i32) -> (i32, i32) {
    %c0_i32 = arith.constant 0 : i32
    %c0_i32_0 = arith.constant 0 : i32
    %c0_i32_1 = arith.constant 0 : i32
    return %c0_i32, %c0_i32_0 : i32, i32
  }
  func.func @transform_11(%arg0: i32) -> (i32, i32) {
    %c0_i32 = arith.constant 0 : i32
    %c0_i32_0 = arith.constant 0 : i32
    %c0_i32_1 = arith.constant 0 : i32
    return %c0_i32, %c0_i32_0 : i32, i32
  }
}

</mosaic_0001>

<bundles_post_ra>
// kernel: tpu_custom_call.1
= control target key start
LH: loop header
LB: loop body
LE: loop exit
PB: predicated region body
PF: predicated region fallthrough
CT: control target
= control target key end

     0   :  { %17 = vsyncpa [#allocation4], 0  ;;  %s856_s0 = inlined_call_operand.vmem [shape: f32[8,16], index: 0, kind: input, shape index: {}]   ;;  %s857_s1 = inlined_call_operand.vmem [shape: f32[8,1], index: 1, kind: input, shape index: {}]   ;;  %s858_s2 = inlined_call_operand.hbm [shape: f32[16,128], index: 2, kind: input, shape index: {}]   ;;  %s859_s3 = inlined_call_operand.vmem [shape: f32[1,128], index: 3, kind: input, shape index: {}]   ;;  %s860_s4 = inlined_call_operand.vmem [shape: f32[1,128], index: 4, kind: input, shape index: {}]   ;;  %s861_s5 = inlined_call_operand.vmem [shape: f32[1,128], index: 5, kind: input, shape index: {}]   ;;  %s862_s6 = inlined_call_operand.hbm [shape: bf16[128,384], index: 6, kind: input, shape index: {}]   ;;  %s863_s7 = inlined_call_operand.vmem [shape: f32[1,384], index: 7, kind: input, shape index: {}]   ;;  %s864_s8 = inlined_call_operand.hbm [shape: bf16[8,128], index: 8, kind: output, shape index: {0}]   ;;  %s865_s9 = inlined_call_operand.vmem [shape: f32[8,1], index: 9, kind: output, shape index: {1}]   ;;  %s866_s10 = inlined_call_operand.vmem [shape: f32[8,1], index: 10, kind: output, shape index: {2}]   ;;  %s867_s11 = inlined_call_operand.vmem [shape: f32[8,1], index: 11, kind: output, shape index: {3}]  }
   0x1   :  { %18 = vsyncpa [#allocation7], 0 }
   0x2   :  { %19 = vsyncpa [#allocation5], 0  ;;  %s723_s17 = smov [#allocation3]  }
   0x3   :  { %s29_s18 = sshll.u32 %s723_s17, 4  ;;  %s30_s18 = int_to_ptr.vmem [resolvable:$true] %s29_s18 }
   0x4   :  { %s665_s19 = scalar_lea.vmem %s30_s18, 256  ;;  %p670_p1 = scmp.lt.s32.totalorder %s30_s18, %s30_s18 }
   0x5   :  { %p666_p0 = scmp.ne.s32.totalorder %s30_s18, %s665_s19  ;;  %p671_p2 = scmp.lt.s32.totalorder %s665_s19, %s665_s19 }
   0x7   :  { %p672_p3 = por %p671_p2, %p670_p1 }
   0x9   :  { %p673_p4 = pnand %p672_p3, %p666_p0 }
   0xb   :  { %676 = shalt.err (!%p673_p4)
}
   0xc   :  { %s724_s20 = smov 128   ;;  %s725_s21 = smov 8  }
   0xd   :  { %35 = dma.hbm_to_vmem [thread:$0]  %s858_s2, 256, %s30_s18, [#allocation4], %s724_s20, %s724_s20, %s725_s21  }
   0xe   :  { %s726_s24 = smov [#allocation6]  }
   0xf   :  { %s47_s25 = sshll.u32 %s726_s24, 4  ;;  %s48_s25 = int_to_ptr.vmem [resolvable:$true] %s47_s25 }
  0x10   :  { %s685_s26 = scalar_lea.vmem %s48_s25, 3072  ;;  %p690_p6 = scmp.lt.s32.totalorder %s48_s25, %s48_s25 }
  0x11   :  { %p686_p5 = scmp.ne.s32.totalorder %s48_s25, %s685_s26  ;;  %p691_p7 = scmp.lt.s32.totalorder %s685_s26, %s685_s26 }
  0x13   :  { %p692_p8 = por %p691_p7, %p690_p6 }
  0x15   :  { %p693_p9 = pnand %p692_p8, %p686_p5 }
  0x17   :  { %696 = shalt.err (!%p693_p9)
}
  0x18   :  { %s727_s27 = smov 192   ;;  %s728_s28 = smov 12  }
  0x19   :  { %53 = dma.hbm_to_vmem [thread:$0]  %s862_s6, 3072, %s48_s25, [#allocation7], %s727_s27, %s727_s27, %s728_s28  }
  0x1a   :  { %717 = dma.done.wait [#allocation4], 256  }
  0x1b   :  { %718 = vsyncadd [#allocation4], 4294967040 }
  0x1c   :  { %719 = dma.done.wait [#allocation7], 3072  }
  0x1d   :  { %720 = vsyncadd [#allocation7], 4294964224  ;;  %v729_v0 = vmov 0.0   ;;  %vm730_vm0 = vmmov 0   ;;  %v69_v1 = vld [vmem:[#allocation3 + $0x8] sm:$0xff]  ;;  %v68_v2 = vld [vmem:[#allocation3] sm:$0xff]  ;;  %v151_v29 = vlaneseq }
  0x1e   :  { %572 = vmatprep.subr.mxu0 %v729_v0  ;;  %576 = vmatprep.mubr.msk.f32.mxu0 %vm730_vm0, %v729_v0  ;;  %v67_v3 = vld [vmem:[%s856_s0] sm:$0xff]  ;;  %vm77_vm1 = vcmask 130048   ;;  %v614_v6 = vld [vmem:[#allocation6 + $0xb0] ss:$12 sps:$4 sm:$0xff]   ;;  %v615_v7 = vld [vmem:[#allocation6 + $0x94] ss:$12 sps:$4 sm:$0xff]  }
  0x1f   :  { %573 = vmatpush3.msra.mxu0 %v69_v1  ;;  %v611_v4 = vld [vmem:[#allocation6 + $0xac] ss:$12 sps:$4 sm:$0xff]   ;;  %v613_v5 = vld [vmem:[#allocation6 + $0xa8] ss:$12 sps:$4 sm:$0xff]   ;;  %v617_v8 = vld [vmem:[#allocation6 + $0x90] ss:$12 sps:$4 sm:$0xff]  }
  0x20   :  { %574 = vmatprep.subr.mxu0 %v729_v0  ;;  %377 = vmatprep.subr.bf16.mxu1 %v611_v4  ;;  %v618_v9 = vld [vmem:[#allocation6 + $0x98] ss:$12 sps:$4 sm:$0xff]   ;;  %v619_v10 = vld [vmem:[#allocation6 + $0x7c] ss:$12 sps:$4 sm:$0xff]   ;;  %v622_v12 = vld [vmem:[#allocation6 + $0x80] ss:$12 sps:$4 sm:$0xff]  }
  0x21   :  { %575 = vmatpush3.msra.mxu0 %v68_v2  ;;  %378 = vmatpush1.bf16.msra.mxu1 %v613_v5  ;;  %v621_v11 = vld [vmem:[#allocation6 + $0x78] ss:$12 sps:$4 sm:$0xff]   ;;  %v625_v14 = vld [vmem:[#allocation6 + $0x60] ss:$12 sps:$4 sm:$0xff]   ;;  %v626_v15 = vld [vmem:[#allocation6 + $0x68] ss:$12 sps:$4 sm:$0xff]  }
  0x22   :  { %577 = vmatmul.mubr.msk.f32.vlgmr.msra.gmra.mxu0 %vm77_vm1, %v67_v3  ;;  %579 = vmatprep.subr.bf16.mxu0 %v729_v0  ;;  %v623_v13 = vld [vmem:[#allocation6 + $0x64] ss:$12 sps:$4 sm:$0xff]   ;;  %v627_v16 = vld [vmem:[#allocation6 + $0x4c] ss:$12 sps:$4 sm:$0xff]   ;;  %v629_v17 = vld [vmem:[#allocation6 + $0x48] ss:$12 sps:$4 sm:$0xff]  }
  0x23   :  { %595 = vmatprep.mubr.msk.bf16.mxu0 %vm730_vm0, %v729_v0  ;;  %580 = vmatpush3.bf16.msra.mxu0 %v614_v6  ;;  %v630_v18 = vld [vmem:[#allocation6 + $0x50] ss:$12 sps:$4 sm:$0xff]   ;;  %v631_v19 = vld [vmem:[#allocation6 + $0x34] ss:$12 sps:$4 sm:$0xff]   ;;  %v634_v21 = vld [vmem:[#allocation6 + $0x38] ss:$12 sps:$4 sm:$0xff]  }
  0x24   :  { %581 = vmatprep.subr.bf16.mxu0 %v729_v0  ;;  %379 = vmatprep.subr.bf16.mxu1 %v615_v7  ;;  %v633_v20 = vld [vmem:[#allocation6 + $0x30] ss:$12 sps:$4 sm:$0xff]   ;;  %v637_v23 = vld [vmem:[#allocation6 + $0x18] ss:$12 sps:$4 sm:$0xff]   ;;  %v638_v24 = vld [vmem:[#allocation6 + $0x20] ss:$12 sps:$4 sm:$0xff]  }
  0x25   :  { %380 = vmatpush1.bf16.msra.mxu1 %v617_v8  ;;  %v635_v22 = vld [vmem:[#allocation6 + $0x1c] ss:$12 sps:$4 sm:$0xff]   ;;  %v639_v25 = vld [vmem:[#allocation6 + $0x4] ss:$12 sps:$4 sm:$0xff]   ;;  %v641_v26 = vld [vmem:[#allocation6] ss:$12 sps:$4 sm:$0xff]  }
  0x26   :  { %381 = vmatprep.subr.bf16.mxu1 %v619_v10  ;;  %v642_v27 = vld [vmem:[#allocation6 + $0x8] ss:$12 sps:$4 sm:$0xff]   ;;  %v731_v28 = vmov 0   ;;  %v152_v30 = vshrl.u32 %v151_v29, 7  ;;  %vm196_vm3 = vcmask 7168   ;;  %v732_v1 = vmov -inf  }
  0x27   :  { %582 = vmatpush3.bf16.msra.mxu0 %v618_v9  ;;  %409 = vmatprep.mubr.bf16.mxu1 %v731_v28  ;;  %v531_v31 = vld [vmem:[%s859_s3] ss:$0 sm:$0xff]  ;;  %197 = vst.msk [vmem:[%s865_s9] sm:$0xff] %vm196_vm3, %v732_v1  ;;  %198 = vst.msk [vmem:[#allocation2] sm:$0xff] %vm196_vm3, %v729_v0  ;;  %s733_s21 = smov [#allocation8]  }
  0x28   :  { %583 = vmatprep.subr.bf16.mxu0 %v729_v0  ;;  %610 = vset.pattern.permute.xlu0 %v731_v28  ;;  %vm153_vm2 = vcmp.lt.s32.totalorder %v152_v30, 6  ;;  %v534_v56 = vld [vmem:[%s860_s4] ss:$0 sm:$0xff]  ;;  %v236_v2 = vsub.s32 0, %v152_v30  ;;  %v240_v3 = vsub.s32 1, %v152_v30  ;;  %v244_v5 = vsub.s32 2, %v152_v30 }
  0x29   :  { %382 = vmatpush1.bf16.msra.mxu1 %v621_v11  ;;  %v533_v33 = vsel %vm153_vm2, 1.0, %v729_v0  ;;  %v535_v58 = vld [vmem:[%s861_s5] ss:$0 sm:$0xff]  ;;  %s509_s22 = sshll.u32 %s733_s21, 4  ;;  %s510_s22 = int_to_ptr.vmem [resolvable:$true] %s509_s22 }
  0x2a   :  { %383 = vmatprep.subr.bf16.mxu1 %v623_v13  ;;  %v232_v4 = vld [vmem:[%s863_s7] sm:$0x7]  ;;  %p702_p11 = scmp.lt.s32.totalorder %s510_s22, %s510_s22 }
  0x2b   :  { %584 = vmatpush3.bf16.msra.mxu0 %v622_v12  ;;  %v237_v6 = vrot.slane %v232_v4, %v236_v2  ;;  %v241_v7 = vrot.slane %v232_v4, %v240_v3  ;;  %v245_v10 = vrot.slane %v232_v4, %v244_v5 }
  0x2c   :  { %585 = vmatprep.subr.bf16.mxu0 %v729_v0 }
  0x2d   :  { %384 = vmatpush1.bf16.msra.mxu1 %v625_v14 }
  0x2e   :  { %385 = vmatprep.subr.bf16.mxu1 %v627_v16 }
  0x2f   :  { %586 = vmatpush3.bf16.msra.mxu0 %v626_v15 }
  0x30   :  { %587 = vmatprep.subr.bf16.mxu0 %v729_v0 }
  0x31   :  { %386 = vmatpush1.bf16.msra.mxu1 %v629_v17 }
  0x32   :  { %387 = vmatprep.subr.bf16.mxu1 %v631_v19 }
  0x33   :  { %588 = vmatpush3.bf16.msra.mxu0 %v630_v18 }
  0x34   :  { %589 = vmatprep.subr.bf16.mxu0 %v729_v0 }
  0x35   :  { %388 = vmatpush1.bf16.msra.mxu1 %v633_v20 }
  0x36   :  { %389 = vmatprep.subr.bf16.mxu1 %v635_v22 }
  0x37   :  { %590 = vmatpush3.bf16.msra.mxu0 %v634_v21  ;;  %v458_v21 = vld [vmem:[%s865_s9] sm:$0xff] }
  0x38   :  { %591 = vmatprep.subr.bf16.mxu0 %v729_v0 }
  0x39   :  { %390 = vmatpush1.bf16.msra.mxu1 %v637_v23 }
  0x3a   :  { %391 = vmatprep.subr.bf16.mxu1 %v639_v25 }
  0x3b   :  { %592 = vmatpush3.bf16.msra.mxu0 %v638_v24 }
  0x3c   :  { %593 = vmatprep.subr.bf16.mxu0 %v729_v0 }
  0x3d   :  { %392 = vmatpush1.bf16.msra.mxu1 %v641_v26 }
  0x3f   :  { %594 = vmatpush3.bf16.msra.mxu0 %v642_v27 }
  0xe2   :  { %v147_v32 = vpop.f32.mrf.mxu0 }
  0xe3   :  { %v148_v34 = vadd.f32 %v531_v31, %v147_v32 }
  0xe4   :  { %v578_v35 = vpop.f32.mrf.mxu0 }
  0xe5   :  { %v156_v36 = vmul.f32 %v533_v33, %v148_v34 }
  0xe7   :  { %v157_v37 = vrot.slane %v156_v36, 4 }
  0xe9   :  { %v158_v38 = vadd.f32 %v157_v37, %v156_v36 }
  0xeb   :  { %v159_v39 = vrot.slane %v158_v38, 2 }
  0xed   :  { %v160_v40 = vadd.f32 %v159_v39, %v158_v38 }
  0xef   :  { %v161_v41 = vrot.slane %v160_v40, 1 }
  0xf1   :  { %v162_v42 = vadd.f32 %v161_v41, %v160_v40 }
  0xf3   :  { %v163_v43 = vmul.f32 0.16666667, %v162_v42 }
  0xf5   :  { %v164_v44 = vsub.f32 %v148_v34, %v163_v43 }
  0xf7   :  { %v165_v45 = vmul.f32 %v533_v33, %v164_v44 }
  0xf9   :  { %v166_v46 = vmul.f32 %v165_v45, %v165_v45 }
  0xfb   :  { %v167_v47 = vrot.slane %v166_v46, 4 }
  0xfd   :  { %v168_v48 = vadd.f32 %v167_v47, %v166_v46 }
  0xff   :  { %v169_v49 = vrot.slane %v168_v48, 2 }
 0x101   :  { %v170_v50 = vadd.f32 %v169_v49, %v168_v48 }
 0x103   :  { %v171_v51 = vrot.slane %v170_v50, 1 }
 0x105   :  { %v172_v52 = vadd.f32 %v171_v51, %v170_v50 }
 0x107   :  { %v173_v53 = vmul.f32 0.16666667, %v172_v52 }
 0x109   :  { %v174_v54 = vadd.f32 0.001, %v173_v53 }
 0x10b   :  { %643 = vrsqrt.f32 %v174_v54 }
 0x118   :  { %v644_v55 = vpop.eup %643 }
 0x119   :  { %v176_v57 = vmul.f32 %v644_v55, %v164_v44 }
 0x11b   :  { %v184_v59 = vmul.f32 %v534_v56, %v176_v57 }
 0x11d   :  { %v192_v60 = vadd.f32 %v535_v58, %v184_v59 }
 0x11f   :  { %v193_v61 = vmax.f32 %v192_v60, 0.0 }
 0x121   :  { %v194_v62 = vpack.c.bf16 %v193_v61, %v193_v61 }
 0x123   :  { %195 = vst [vmem:[#allocation8] sm:$0xf] %v194_v62 }
 0x12a   :  { %v199_v63 = vld [vmem:[#allocation8] sm:$0xf] }
 0x12b   :  { %410 = vmatmul.mubr.bf16.vlgmr.msra.gmra.mxu1 %v199_v63  ;;  %596 = vmatmul.mubr.bf16.vlgmr.msra.gmra.mxu0 %v199_v63 }
 0x1eb   :  { %v411_v8 = vpop.f32.mrf.mxu1  ;;  %v452_v9 = vpop.f32.mrf.mxu0 }
 0x1ec   :  { %v412_v13 = vadd.f32 %v411_v8, %v237_v6  ;;  %v453_v17 = vadd.f32 %v452_v9, %v245_v10 }
 0x1ed   :  { %v413_v11 = vpop.f32.mrf.mxu1  ;;  %v597_v12 = vpop.f32.mrf.mxu0 }
 0x1ee   :  { %v414_v14 = vadd.f32 %v413_v11, %v241_v7 }
 0x1ef   :  { %v415_v15 = vpop.f32.mrf.mxu1  ;;  %v455_v16 = vpop.f32.mrf.mxu0 }
 0x1f0   :  { %v459_v0 = vmax.f32 %v412_v13, %v414_v14 }
 0x1f1   :  { %v416_v18 = vpop.f32.mrf.mxu1  ;;  %v598_v19 = vpop.f32.mrf.mxu0 }
 0x1f2   :  { %v460_v20 = vmax.f32 %v459_v0, %v453_v17 }
 0x1f4   :  { %461 = vmax.xlane.f32.xlu0 %v460_v20 }
 0x27d   :  { %v462_v22 = vpop.xlane.xlu0 %461 }
 0x27e   :  { %v463_v23 = vmax.f32 %v458_v21, %v462_v22 }
 0x280   :  { %v465_v24 = vsub.f32 %v458_v21, %v463_v23  ;;  %490 = vst.msk [vmem:[%s865_s9] sm:$0xff] %vm196_vm3, %v463_v23  ;;  %471 = vperm.xlu0 %610, %v463_v23   ;;  %s697_s9 = scalar_lea.vmem %s510_s22, 64 }
 0x281   :  { %p698_p10 = scmp.ne.s32.totalorder %s510_s22, %s697_s9  ;;  %p703_p12 = scmp.lt.s32.totalorder %s697_s9, %s697_s9 }
 0x283   :  { %p704_p13 = por %p703_p12, %p702_p11 }
 0x285   :  { %p705_p0 = pnand %p704_p13, %p698_p10 }
 0x2fb   :  { %v472_v25 = vpop.permute.xlu0 %471 }
 0x2fc   :  { %v474_v26 = vsub.f32 %v412_v13, %v472_v25  ;;  %v475_v27 = vsub.f32 %v414_v14, %v472_v25  ;;  %v476_v28 = vsub.f32 %v453_v17, %v472_v25 }
 0x2fe   :  { %v477_v29 = vmul.f32 1.442695, %v474_v26  ;;  %v479_v30 = vmul.f32 1.442695, %v475_v27  ;;  %v481_v31 = vmul.f32 1.442695, %v476_v28 }
 0x300   :  { %645 = vpow2.f32 %v477_v29 }
 0x301   :  { %647 = vpow2.f32 %v479_v30 }
 0x302   :  { %649 = vpow2.f32 %v481_v31 }
 0x30d   :  { %v646_v32 = vpop.eup %645 }
 0x30e   :  { %v648_v33 = vpop.eup %647 }
 0x30f   :  { %v483_v34 = vadd.f32 %v648_v33, %v646_v32  ;;  %v650_v35 = vpop.eup %649 }
 0x311   :  { %v484_v36 = vadd.f32 %v650_v35, %v483_v34 }
 0x313   :  { %485 = vadd.xlane.f32.xlu1 %v484_v36 }
 0x314   :  { %708 = shalt.err (!%p705_p0)
}
 0x315   :  { %512 = dma.vmem_to_hbm [thread:$0]  %s510_s22, 64, %s864_s8, [#allocation5]   ;;  %v466_v37 = vmul.f32 1.442695, %v465_v24  ;;  %v464_v39 = vld [vmem:[#allocation2] sm:$0xff] }
 0x316   :  { %v496_v40 = vld [vmem:[%s857_s1] sm:$0xff] }
 0x317   :  { %651 = vpow2.f32 %v466_v37  ;;  %v497_v43 = vmin.f32 %v496_v40, 12.0 }
 0x319   :  { %v498_v45 = vmul.f32 1.442695, %v497_v43 }
 0x31b   :  { %653 = vpow2.f32 %v498_v45 }
 0x324   :  { %v652_v38 = vpop.eup %651 }
 0x325   :  { %v468_v41 = vmul.f32 %v652_v38, %v464_v39 }
 0x328   :  { %v654_v47 = vpop.eup %653 }
 0x39c   :  { %v486_v42 = vpop.xlane.xlu1 %485 }
 0x39d   :  { %v487_v44 = vadd.f32 %v486_v42, %v468_v41 }
 0x39f   :  { %489 = vst.msk [vmem:[#allocation2] sm:$0xff] %vm196_vm3, %v487_v44 }
 0x3a6   :  { %v494_v46 = vld [vmem:[#allocation2] sm:$0xff] }
 0x3a7   :  { %655 = vrcp.f32 %v494_v46 }
 0x3b4   :  { %v656_v48 = vpop.eup %655 }
 0x3b5   :  { %500 = vst.msk [vmem:[%s866_s10] sm:$0xff] %vm196_vm3, %v656_v48  ;;  %v501_v49 = vmul.f32 %v656_v48, %v654_v47 }
 0x3b7   :  { %502 = vst.msk [vmem:[%s867_s11] sm:$0xff] %vm196_vm3, %v501_v49 }
 0x3b8   :  { %721 = dma.done.wait [#allocation5], 64  }
 0x3b9   :  { %722 = vsyncadd [#allocation5], 4294967232 }
 0x3ba   :  { %528 = vsyncpa [#allocation4], 1 }
 0x3bb   :  { %529 = vsyncpa [#allocation7], 1 }
 0x3bc   :  { %530 = vsyncpa [#allocation5], 1 }

</bundles_post_ra>
